<compile_context>
chip_gen: v7x
topology: tpu7x:2x2x1
jax: 0.10.0
libtpu: 0.0.40
codegen_flags: <defaults>
</compile_context>

<pallas_src>
import jax
import jax.numpy as jnp
from jax import lax
from jax.experimental import pallas as pl
from jax.experimental.pallas import tpu as pltpu


def _erf_approx(x):
    """Abramowitz & Stegun 7.1.26 erf approximation, |error| <= 1.5e-7 (f32)."""
    a1, a2, a3, a4, a5 = (0.254829592, -0.284496736, 1.421413741,
                          -1.453152027, 1.061405429)
    p = 0.3275911
    ax = jnp.abs(x)
    t = 1.0 / (1.0 + p * ax)
    poly = t * (a1 + t * (a2 + t * (a3 + t * (a4 + t * a5))))
    y = 1.0 - poly * jnp.exp(-ax * ax)
    return jnp.where(x >= 0, y, -y)


def _gelu_exact(x):
    # nn.GELU() default: 0.5 * x * (1 + erf(x / sqrt(2)))
    return 0.5 * x * (1.0 + _erf_approx(x * 0.7071067811865476))


def _mlp_kernel(x_ref, w1_ref, b1_ref, w2_ref, b2_ref, o_ref):
    # x_ref : (TR, Cin)   row tile of flattened tokens
    # w1_ref: (H, Cin)    torch Linear weight (out, in)
    # b1_ref: (1, H)
    # w2_ref: (Cout, H)
    # b2_ref: (1, Cout)
    # o_ref : (TR, Cout)
    x = x_ref[...]

    # h = x @ W1.T + b1   — contraction on last dims of both operands (no .T).
    h = lax.dot_general(x, w1_ref[...], (((1,), (1,)), ((), ())),
                        preferred_element_type=jnp.float32)
    h = h + b1_ref[...].astype(jnp.float32)
    h = _gelu_exact(h)

    # y = h @ W2.T + b2
    y = lax.dot_general(h, w2_ref[...], (((1,), (1,)), ((), ())),
                        preferred_element_type=jnp.float32)
    y = y + b2_ref[...].astype(jnp.float32)

    o_ref[...] = y.astype(o_ref.dtype)


def mlp(x, w1, b1, w2, b2, *, row_tile=512):
    """x: (B, N, Cin); w1: (H, Cin); b1: (H,); w2: (Cout, H); b2: (Cout,)
    -> (B, N, Cout).  Matches torch Mlp.forward with drop=0.0."""
    B, N, Cin = x.shape
    H = w1.shape[0]
    Cout = w2.shape[0]

    R = B * N
    xf = x.reshape(R, Cin)            # collapse batch: fills MXU rows, 1 grid step
                                      # at small sizes (v5e/v6e single-TC friendly)
    if R <= row_tile:
        TR, Rp = R, R
    else:
        TR = row_tile                 # multiple of 8 -> valid sublane block
        Rp = pl.cdiv(R, TR) * TR
        if Rp != R:
            xf = jnp.pad(xf, ((0, Rp - R), (0, 0)))

    out = pl.pallas_call(
        _mlp_kernel,
        out_shape=jax.ShapeDtypeStruct((Rp, Cout), x.dtype),
        grid_spec=pltpu.PrefetchScalarGridSpec(
            num_scalar_prefetch=0,
            grid=(Rp // TR,),
            in_specs=[
                pl.BlockSpec((TR, Cin),  lambda i: (i, 0)),  # x rows (tiled)
                pl.BlockSpec((H, Cin),   lambda i: (0, 0)),  # W1 (resident)
                pl.BlockSpec((1, H),     lambda i: (0, 0)),  # b1
                pl.BlockSpec((Cout, H),  lambda i: (0, 0)),  # W2 (resident)
                pl.BlockSpec((1, Cout),  lambda i: (0, 0)),  # b2
            ],
            out_specs=pl.BlockSpec((TR, Cout), lambda i: (i, 0)),
        ),
        compiler_params=pltpu.CompilerParams(
            dimension_semantics=("parallel",)),
    )(xf, w1, b1.reshape(1, H), w2, b2.reshape(1, Cout))

    return out[:R].reshape(B, N, Cout)


def mlp_ref(x, w1, b1, w2, b2):
    """Pure-JAX reference mirroring the PyTorch forward (exact GELU, drop=0)."""
    h = jnp.einsum('bnc,hc->bnh', x, w1) + b1
    h = jax.nn.gelu(h, approximate=False)
    y = jnp.einsum('bnh,oh->bno', h, w2) + b2
    return y


if __name__ == "__main__":
    # Small deterministic example: B=2, N=64 tokens (8x8 spatial), in=out=32,
    # hidden=128 (the usual 4x expansion in this model family).
    B, N, Cin, H = 2, 64, 32, 128
    Cout = Cin  # out_features defaults to in_features

    key = jax.random.PRNGKey(0)
    kx, k1, kb1, k2, kb2 = jax.random.split(key, 5)

    x  = jax.random.normal(kx,  (B, N, Cin), dtype=jnp.float32)
    w1 = jax.random.normal(k1,  (H, Cin),    dtype=jnp.float32) * 0.1   # fc1.weight
    b1 = jax.random.normal(kb1, (H,),        dtype=jnp.float32) * 0.1   # fc1.bias
    w2 = jax.random.normal(k2,  (Cout, H),   dtype=jnp.float32) * 0.1   # fc2.weight
    b2 = jax.random.normal(kb2, (Cout,),     dtype=jnp.float32) * 0.1   # fc2.bias

    out = mlp(x, w1, b1, w2, b2)
    out = jax.block_until_ready(out)

    ref = mlp_ref(x, w1, b1, w2, b2)
    assert out.shape == (B, N, Cout)
    assert jnp.allclose(out, ref, atol=2e-4, rtol=2e-4), (
        f"max abs diff {jnp.max(jnp.abs(out - ref))}")

    print("KERNEL_OK")
</pallas_src>

<mosaic_0001>
module attributes {stable_mosaic.version = 11 : i64} {
  func.func @_mlp_kernel(%arg0: i32, %arg1: memref<128x32xf32, #tpu.memory_space<vmem>>, %arg2: memref<128x32xf32, #tpu.memory_space<vmem>>, %arg3: memref<1x128xf32, #tpu.memory_space<vmem>>, %arg4: memref<32x128xf32, #tpu.memory_space<vmem>>, %arg5: memref<1x32xf32, #tpu.memory_space<vmem>>, %arg6: memref<128x32xf32, #tpu.memory_space<vmem>>) attributes {dimension_semantics = [#tpu.dimension_semantics<parallel>], iteration_bounds = array<i64: 1>, scalar_prefetch = 0 : i64, scratch_operands = 0 : i64, tpu.core_type = #tpu.core_type<tc>, window_params = [{transform_indices = @transform_0, window_bounds = array<i64: 128, 32>}, {pipeline_mode = #tpu.pipeline_mode<synchronous>, transform_indices = @transform_1, window_bounds = array<i64: 128, 32>}, {pipeline_mode = #tpu.pipeline_mode<synchronous>, transform_indices = @transform_2, window_bounds = array<i64: 1, 128>}, {pipeline_mode = #tpu.pipeline_mode<synchronous>, transform_indices = @transform_3, window_bounds = array<i64: 32, 128>}, {pipeline_mode = #tpu.pipeline_mode<synchronous>, transform_indices = @transform_4, window_bounds = array<i64: 1, 32>}, {transform_indices = @transform_5, window_bounds = array<i64: 128, 32>}]} {
    %c0 = arith.constant 0 : index
    %c0_0 = arith.constant 0 : index
    %0 = vector.load %arg1[%c0, %c0_0] : memref<128x32xf32, #tpu.memory_space<vmem>>, vector<128x32xf32>
    %c0_1 = arith.constant 0 : index
    %c0_2 = arith.constant 0 : index
    %1 = vector.load %arg2[%c0_1, %c0_2] : memref<128x32xf32, #tpu.memory_space<vmem>>, vector<128x32xf32>
    %cst = arith.constant dense<0.000000e+00> : vector<128x128xf32>
    %2 = tpu.matmul %0, %1, %cst {dimension_numbers = #tpu.dot_dimension_numbers<[1], [1], [0], [0], [0, 0, 1, 0], [], []>} : vector<128x32xf32>, vector<128x32xf32>, vector<128x128xf32> -> vector<128x128xf32>
    %c0_3 = arith.constant 0 : index
    %c0_4 = arith.constant 0 : index
    %3 = vector.load %arg3[%c0_3, %c0_4] : memref<1x128xf32, #tpu.memory_space<vmem>>, vector<1x128xf32>
    %4 = vector.broadcast %3 : vector<1x128xf32> to vector<128x128xf32>
    %5 = arith.addf %2, %4 : vector<128x128xf32>
    %cst_5 = arith.constant 5.000000e-01 : f32
    %6 = vector.broadcast %cst_5 : f32 to vector<128x128xf32>
    %7 = arith.mulf %6, %5 : vector<128x128xf32>
    %cst_6 = arith.constant 0.707106769 : f32
    %8 = vector.broadcast %cst_6 : f32 to vector<128x128xf32>
    %9 = arith.mulf %5, %8 : vector<128x128xf32>
    %10 = math.absf %9 : vector<128x128xf32>
    %cst_7 = arith.constant 0.327591091 : f32
    %11 = vector.broadcast %cst_7 : f32 to vector<128x128xf32>
    %12 = arith.mulf %11, %10 : vector<128x128xf32>
    %cst_8 = arith.constant 1.000000e+00 : f32
    %13 = vector.broadcast %cst_8 : f32 to vector<128x128xf32>
    %14 = arith.addf %13, %12 : vector<128x128xf32>
    %cst_9 = arith.constant 1.000000e+00 : f32
    %15 = vector.broadcast %cst_9 : f32 to vector<128x128xf32>
    %16 = arith.divf %15, %14 : vector<128x128xf32>
    %cst_10 = arith.constant 1.06140542 : f32
    %17 = vector.broadcast %cst_10 : f32 to vector<128x128xf32>
    %18 = arith.mulf %16, %17 : vector<128x128xf32>
    %cst_11 = arith.constant -1.45315206 : f32
    %19 = vector.broadcast %cst_11 : f32 to vector<128x128xf32>
    %20 = arith.addf %19, %18 : vector<128x128xf32>
    %21 = arith.mulf %16, %20 : vector<128x128xf32>
    %cst_12 = arith.constant 1.42141378 : f32
    %22 = vector.broadcast %cst_12 : f32 to vector<128x128xf32>
    %23 = arith.addf %22, %21 : vector<128x128xf32>
    %24 = arith.mulf %16, %23 : vector<128x128xf32>
    %cst_13 = arith.constant -0.284496725 : f32
    %25 = vector.broadcast %cst_13 : f32 to vector<128x128xf32>
    %26 = arith.addf %25, %24 : vector<128x128xf32>
    %27 = arith.mulf %16, %26 : vector<128x128xf32>
    %cst_14 = arith.constant 0.254829586 : f32
    %28 = vector.broadcast %cst_14 : f32 to vector<128x128xf32>
    %29 = arith.addf %28, %27 : vector<128x128xf32>
    %30 = arith.mulf %16, %29 : vector<128x128xf32>
    %cst_15 = arith.constant 0.000000e+00 : f32
    %31 = vector.broadcast %cst_15 : f32 to vector<128x128xf32>
    %32 = arith.subf %31, %10 : vector<128x128xf32>
    %33 = arith.mulf %32, %10 : vector<128x128xf32>
    %34 = math.exp %33 : vector<128x128xf32>
    %35 = arith.mulf %30, %34 : vector<128x128xf32>
    %cst_16 = arith.constant 1.000000e+00 : f32
    %36 = vector.broadcast %cst_16 : f32 to vector<128x128xf32>
    %37 = arith.subf %36, %35 : vector<128x128xf32>
    %cst_17 = arith.constant 0.000000e+00 : f32
    %38 = vector.broadcast %cst_17 : f32 to vector<128x128xf32>
    %39 = arith.cmpf oge, %9, %38 : vector<128x128xf32>
    %cst_18 = arith.constant 0.000000e+00 : f32
    %40 = vector.broadcast %cst_18 : f32 to vector<128x128xf32>
    %41 = arith.subf %40, %37 : vector<128x128xf32>
    %42 = arith.select %39, %37, %41 : vector<128x128xi1>, vector<128x128xf32>
    %cst_19 = arith.constant 1.000000e+00 : f32
    %43 = vector.broadcast %cst_19 : f32 to vector<128x128xf32>
    %44 = arith.addf %43, %42 : vector<128x128xf32>
    %45 = arith.mulf %7, %44 : vector<128x128xf32>
    %c0_20 = arith.constant 0 : index
    %c0_21 = arith.constant 0 : index
    %46 = vector.load %arg4[%c0_20, %c0_21] : memref<32x128xf32, #tpu.memory_space<vmem>>, vector<32x128xf32>
    %cst_22 = arith.constant dense<0.000000e+00> : vector<128x32xf32>
    %47 = tpu.matmul %45, %46, %cst_22 {dimension_numbers = #tpu.dot_dimension_numbers<[1], [1], [0], [0], [0, 0, 1, 0], [], []>} : vector<128x128xf32>, vector<32x128xf32>, vector<128x32xf32> -> vector<128x32xf32>
    %c0_23 = arith.constant 0 : index
    %c0_24 = arith.constant 0 : index
    %48 = vector.load %arg5[%c0_23, %c0_24] : memref<1x32xf32, #tpu.memory_space<vmem>>, vector<1x32xf32>
    %49 = vector.broadcast %48 : vector<1x32xf32> to vector<128x32xf32>
    %50 = arith.addf %47, %49 : vector<128x32xf32>
    %c0_25 = arith.constant 0 : index
    %c0_26 = arith.constant 0 : index
    %51 = vector.load %arg6[%c0_25, %c0_26] : memref<128x32xf32, #tpu.memory_space<vmem>>, vector<128x32xf32>
    tpu.vector_store %arg6[%c0_25, %c0_26], %50 {strides = array<i32>} : memref<128x32xf32, #tpu.memory_space<vmem>>, vector<128x32xf32>,
    return
  }
  func.func @transform_0(%arg0: i32) -> (i32, i32) {
    %c0_i32 = arith.constant 0 : i32
    %c0_i32_0 = arith.constant 0 : i32
    return %arg0, %c0_i32 : i32, i32
  }
  func.func @transform_1(%arg0: i32) -> (i32, i32) {
    %c0_i32 = arith.constant 0 : i32
    %c0_i32_0 = arith.constant 0 : i32
    %c0_i32_1 = arith.constant 0 : i32
    return %c0_i32, %c0_i32_0 : i32, i32
  }
  func.func @transform_2(%arg0: i32) -> (i32, i32) {
    %c0_i32 = arith.constant 0 : i32
    %c0_i32_0 = arith.constant 0 : i32
    %c0_i32_1 = arith.constant 0 : i32
    return %c0_i32, %c0_i32_0 : i32, i32
  }
  func.func @transform_3(%arg0: i32) -> (i32, i32) {
    %c0_i32 = arith.constant 0 : i32
    %c0_i32_0 = arith.constant 0 : i32
    %c0_i32_1 = arith.constant 0 : i32
    return %c0_i32, %c0_i32_0 : i32, i32
  }
  func.func @transform_4(%arg0: i32) -> (i32, i32) {
    %c0_i32 = arith.constant 0 : i32
    %c0_i32_0 = arith.constant 0 : i32
    %c0_i32_1 = arith.constant 0 : i32
    return %c0_i32, %c0_i32_0 : i32, i32
  }
  func.func @transform_5(%arg0: i32) -> (i32, i32) {
    %c0_i32 = arith.constant 0 : i32
    %c0_i32_0 = arith.constant 0 : i32
    return %arg0, %c0_i32 : i32, i32
  }
}

</mosaic_0001>

<bundles_post_ra>
// kernel: tpu_custom_call.1
= control target key start
LH: loop header
LB: loop body
LE: loop exit
PB: predicated region body
PF: predicated region fallthrough
CT: control target
= control target key end

     0   :  { %vm59_vm0 = vcmask 261120   ;;  %s1799_s1 = inlined_call_operand.vmem [shape: f32[128,32], index: 1, kind: input, shape index: {}]   ;;  %s1800_s0 = inlined_call_operand.vmem [shape: f32[128,32], index: 0, kind: input, shape index: {}]   ;;  %s1801_s3 = inlined_call_operand.vmem [shape: f32[32,128], index: 3, kind: input, shape index: {}]   ;;  %s1802_s2 = inlined_call_operand.vmem [shape: f32[1,128], index: 2, kind: input, shape index: {}]   ;;  %s1803_s4 = inlined_call_operand.vmem [shape: f32[1,32], index: 4, kind: input, shape index: {}]   ;;  %s1804_s5 = inlined_call_operand.vmem [shape: f32[128,32], index: 5, kind: output, shape index: {}]  }
   0x1   :  { %v36_v0 = vld [vmem:[%s1799_s1] sm:$0xff]  ;;  %v37_v1 = vld [vmem:[%s1799_s1 + $0x8] sm:$0xff]  ;;  %vm1241_vm1 = vmpackc.low %vm59_vm0, %vm59_vm0 }
   0x2   :  { %v1083_v3 = vpack.c.bf16 %v37_v1, %v36_v0  ;;  %v38_v4 = vld [vmem:[%s1799_s1 + $0x10] sm:$0xff]  ;;  %v39_v5 = vld [vmem:[%s1799_s1 + $0x18] sm:$0xff]  ;;  %v20_v7 = vld [vmem:[%s1800_s0] sm:$0xff] }
   0x3   :  { %v1089_v6 = vpack.c.bf16 %v39_v5, %v38_v4  ;;  %v40_v8 = vld [vmem:[%s1799_s1 + $0x20] sm:$0xff]  ;;  %v41_v9 = vld [vmem:[%s1799_s1 + $0x28] sm:$0xff]  ;;  %1027 = vmatprep.mubr.msk.f32.mxu0 %vm59_vm0, %v20_v7  ;;  %v42_v11 = vld [vmem:[%s1799_s1 + $0x30] sm:$0xff] }
   0x4   :  { %1085 = vmatprep.subr.msk.bf16.mxu0 %vm1241_vm1, %v1083_v3  ;;  %v1095_v10 = vpack.c.bf16 %v41_v9, %v40_v8  ;;  %v43_v12 = vld [vmem:[%s1799_s1 + $0x38] sm:$0xff]  ;;  %v44_v14 = vld [vmem:[%s1799_s1 + $0x40] sm:$0xff]  ;;  %v45_v15 = vld [vmem:[%s1799_s1 + $0x48] sm:$0xff] }
   0x5   :  { %1088 = vmatpush3.bf16.xpose.msk.msra.mxu0 %vm1241_vm1, %v1083_v3  ;;  %v1101_v13 = vpack.c.bf16 %v43_v12, %v42_v11  ;;  %v1107_v16 = vpack.c.bf16 %v45_v15, %v44_v14  ;;  %v46_v17 = vld [vmem:[%s1799_s1 + $0x50] sm:$0xff]  ;;  %v47_v18 = vld [vmem:[%s1799_s1 + $0x58] sm:$0xff]  ;;  %v48_v20 = vld [vmem:[%s1799_s1 + $0x60] sm:$0xff] }
   0x6   :  { %1091 = vmatprep.subr.msk.bf16.mxu0 %vm1241_vm1, %v1089_v6  ;;  %v1113_v19 = vpack.c.bf16 %v47_v18, %v46_v17  ;;  %v49_v21 = vld [vmem:[%s1799_s1 + $0x68] sm:$0xff]  ;;  %v50_v23 = vld [vmem:[%s1799_s1 + $0x70] sm:$0xff]  ;;  %v51_v24 = vld [vmem:[%s1799_s1 + $0x78] sm:$0xff] }
   0x7   :  { %v1119_v22 = vpack.c.bf16 %v49_v21, %v48_v20  ;;  %v1125_v25 = vpack.c.bf16 %v51_v24, %v50_v23  ;;  %v21_v26 = vld [vmem:[%s1800_s0 + $0x8] sm:$0xff]  ;;  %v22_v27 = vld [vmem:[%s1800_s0 + $0x10] sm:$0xff]  ;;  %v23_v28 = vld [vmem:[%s1800_s0 + $0x18] sm:$0xff] }
   0x8   :  { %v24_v29 = vld [vmem:[%s1800_s0 + $0x20] sm:$0xff]  ;;  %v25_v30 = vld [vmem:[%s1800_s0 + $0x28] sm:$0xff]  ;;  %v26_v31 = vld [vmem:[%s1800_s0 + $0x30] sm:$0xff] }
   0x9   :  { %v27_v32 = vld [vmem:[%s1800_s0 + $0x38] sm:$0xff]  ;;  %v28_v33 = vld [vmem:[%s1800_s0 + $0x40] sm:$0xff]  ;;  %v29_v34 = vld [vmem:[%s1800_s0 + $0x48] sm:$0xff] }
   0xa   :  { %v30_v35 = vld [vmem:[%s1800_s0 + $0x50] sm:$0xff]  ;;  %v31_v36 = vld [vmem:[%s1800_s0 + $0x58] sm:$0xff]  ;;  %v32_v37 = vld [vmem:[%s1800_s0 + $0x60] sm:$0xff] }
   0xb   :  { %v33_v38 = vld [vmem:[%s1800_s0 + $0x68] sm:$0xff]  ;;  %v34_v39 = vld [vmem:[%s1800_s0 + $0x70] sm:$0xff]  ;;  %v35_v40 = vld [vmem:[%s1800_s0 + $0x78] sm:$0xff] }
   0xc   :  { %v733_v41 = vld [vmem:[%s1801_s3] sm:$0xff]  ;;  %v734_v42 = vld [vmem:[%s1801_s3 + $0x8] sm:$0xff]  ;;  %v735_v44 = vld [vmem:[%s1801_s3 + $0x10] sm:$0xff] }
   0xd   :  { %1094 = vmatpush3.bf16.xpose.msk.msra.mxu0 %vm1241_vm1, %v1089_v6  ;;  %v1131_v43 = vpack.c.bf16 %v734_v42, %v733_v41  ;;  %v736_v45 = vld [vmem:[%s1801_s3 + $0x18] sm:$0xff]  ;;  %v1398_v47 = vld [vmem:[%s1802_s2] ss:$0 sm:$0xff] }
   0xe   :  { %1097 = vmatprep.subr.msk.bf16.mxu0 %vm1241_vm1, %v1095_v10  ;;  %v1135_v46 = vpack.c.bf16 %v736_v45, %v735_v44 }
   0xf   :  { %1132 = vmatprep.subr.bf16.mxu1 %v1131_v43 }
  0x10   :  { %1134 = vmatpush3.bf16.xpose.msra.mxu1 %v1131_v43 }
  0x11   :  { %1136 = vmatprep.subr.bf16.mxu1 %v1135_v46 }
  0x15   :  { %1100 = vmatpush3.bf16.xpose.msk.msra.mxu0 %vm1241_vm1, %v1095_v10 }
  0x16   :  { %1103 = vmatprep.subr.msk.bf16.mxu0 %vm1241_vm1, %v1101_v13 }
  0x18   :  { %1138 = vmatpush3.bf16.xpose.msra.mxu1 %v1135_v46 }
  0x1d   :  { %1106 = vmatpush3.bf16.xpose.msk.msra.mxu0 %vm1241_vm1, %v1101_v13 }
  0x1e   :  { %1109 = vmatprep.subr.msk.bf16.mxu0 %vm1241_vm1, %v1107_v16 }
  0x25   :  { %1112 = vmatpush3.bf16.xpose.msk.msra.mxu0 %vm1241_vm1, %v1107_v16 }
  0x26   :  { %1115 = vmatprep.subr.msk.bf16.mxu0 %vm1241_vm1, %v1113_v19 }
  0x2d   :  { %1118 = vmatpush3.bf16.xpose.msk.msra.mxu0 %vm1241_vm1, %v1113_v19 }
  0x2e   :  { %1121 = vmatprep.subr.msk.bf16.mxu0 %vm1241_vm1, %v1119_v22 }
  0x35   :  { %1124 = vmatpush3.bf16.xpose.msk.msra.mxu0 %vm1241_vm1, %v1119_v22 }
  0x36   :  { %1127 = vmatprep.subr.msk.bf16.mxu0 %vm1241_vm1, %v1125_v25 }
  0x3d   :  { %1130 = vmatpush3.bf16.xpose.msk.msra.mxu0 %vm1241_vm1, %v1125_v25 }
  0x44   :  { %1028 = vmatmul.mubr.msk.f32.vlgmr.msra.gmra.mrb[0].mxu0 %vm59_vm0, %v21_v26 }
  0x45   :  { %1030 = vmatprep.mubr.msk.f32.mxu0 %vm59_vm0, %v22_v27 }
  0x48   :  { %1031 = vmatmul.mubr.msk.f32.gmra.mrb[2].mxu0 %vm59_vm0, %v23_v28 }
  0x49   :  { %1033 = vmatprep.mubr.msk.f32.mxu0 %vm59_vm0, %v24_v29 }
  0x4c   :  { %1034 = vmatmul.mubr.msk.f32.gmra.mrb[4].mxu0 %vm59_vm0, %v25_v30 }
  0x4d   :  { %1036 = vmatprep.mubr.msk.f32.mxu0 %vm59_vm0, %v26_v31 }
  0x50   :  { %1037 = vmatmul.mubr.msk.f32.gmra.mrb[6].mxu0 %vm59_vm0, %v27_v32 }
  0x51   :  { %1039 = vmatprep.mubr.msk.f32.mxu0 %vm59_vm0, %v28_v33 }
  0x54   :  { %1040 = vmatmul.mubr.msk.f32.gmra.mrb[8].mxu0 %vm59_vm0, %v29_v34 }
  0x55   :  { %1042 = vmatprep.mubr.msk.f32.mxu0 %vm59_vm0, %v30_v35 }
  0x58   :  { %1043 = vmatmul.mubr.msk.f32.gmra.mrb[10].mxu0 %vm59_vm0, %v31_v36 }
  0x59   :  { %1045 = vmatprep.mubr.msk.f32.mxu0 %vm59_vm0, %v32_v37 }
  0x5c   :  { %1046 = vmatmul.mubr.msk.f32.gmra.mrb[12].mxu0 %vm59_vm0, %v33_v38 }
  0x5d   :  { %1048 = vmatprep.mubr.msk.f32.mxu0 %vm59_vm0, %v34_v39 }
  0x60   :  { %1049 = vmatmul.mubr.msk.f32.gmra.mrb[14].mxu0 %vm59_vm0, %v35_v40 }
 0x117   :  { %v1029_v48 = vpop.f32.mrb[0].mxu0 }
 0x118   :  { %v228_v49 = vadd.f32 %v1029_v48, %v1398_v47  ;;  %v222_v50 = vpop.f32.mrb[1].mxu0 }
 0x119   :  { %v223_v51 = vadd.f32 %v1398_v47, %v222_v50 }
 0x11a   :  { %v1402_v52 = vmul.f32 0.70710677, %v228_v49  ;;  %v1417_v12 = vmul.f32 0.5, %v228_v49 }
 0x11b   :  { %v1404_v53 = vmul.f32 0.70710677, %v223_v51  ;;  %v1032_v54 = vpop.f32.mrb[2].mxu0  ;;  %v1422_v19 = vmul.f32 0.5, %v223_v51 }
 0x11c   :  { %v334_v55 = vand.u32 2147483647, %v1402_v52  ;;  %v238_v56 = vadd.f32 %v1032_v54, %v1398_v47  ;;  %v232_v57 = vpop.f32.mrb[3].mxu0  ;;  %vm654_vm3 = vcmp.ge.f32.partialorder %v1402_v52, 0.0 }
 0x11d   :  { %v333_v58 = vand.u32 2147483647, %v1404_v53  ;;  %v233_v59 = vadd.f32 %v1398_v47, %v232_v57  ;;  %vm653_vm2 = vcmp.ge.f32.partialorder %v1404_v53, 0.0 }
 0x11e   :  { %v1410_v60 = vmul.f32 0.70710677, %v238_v56  ;;  %v350_v61 = vmul.f32 0.3275911, %v334_v55  ;;  %v558_v63 = vsub.f32 0.0, %v334_v55  ;;  %v1424_v20 = vmul.f32 0.5, %v238_v56 }
 0x11f   :  { %v1412_v62 = vmul.f32 0.70710677, %v233_v59  ;;  %v1035_v1 = vpop.f32.mrb[4].mxu0  ;;  %v557_v2 = vsub.f32 0.0, %v333_v58  ;;  %v349_v5 = vmul.f32 0.3275911, %v333_v58 }
 0x120   :  { %v336_v0 = vand.u32 2147483647, %v1410_v60  ;;  %v242_v4 = vpop.f32.mrb[5].mxu0  ;;  %v366_v6 = vadd.f32 1.0, %v350_v61  ;;  %v574_v8 = vmul.f32 %v558_v63, %v334_v55  ;;  %v248_v10 = vadd.f32 %v1035_v1, %v1398_v47 }
 0x121   :  { %v335_v3 = vand.u32 2147483647, %v1412_v62  ;;  %v573_v13 = vmul.f32 %v557_v2, %v333_v58  ;;  %v243_v15 = vadd.f32 %v1398_v47, %v242_v4  ;;  %v365_v16 = vadd.f32 1.0, %v349_v5 }
 0x122   :  { %v560_v9 = vsub.f32 0.0, %v336_v0  ;;  %v352_v17 = vmul.f32 0.3275911, %v336_v0  ;;  %v1420_v18 = vmul.f32 0.70710677, %v248_v10  ;;  %1139 = vrcp.f32 %v366_v6 }
 0x123   :  { %v1038_v7 = vpop.f32.mrb[6].mxu0  ;;  %v559_v14 = vsub.f32 0.0, %v335_v3  ;;  %v351_v21 = vmul.f32 0.3275911, %v335_v3  ;;  %v1426_v22 = vmul.f32 0.70710677, %v243_v15  ;;  %1141 = vrcp.f32 %v365_v16 }
 0x124   :  { %v252_v11 = vpop.f32.mrb[7].mxu0  ;;  %v591_v24 = vmul.f32 1.442695, %v574_v8  ;;  %v576_v25 = vmul.f32 %v560_v9, %v336_v0  ;;  %v338_v26 = vand.u32 2147483647, %v1420_v18  ;;  %v258_v27 = vadd.f32 %v1038_v7, %v1398_v47 }
 0x125   :  { %v589_v29 = vmul.f32 1.442695, %v573_v13  ;;  %v575_v30 = vmul.f32 %v559_v14, %v335_v3  ;;  %v337_v31 = vand.u32 2147483647, %v1426_v22  ;;  %v253_v32 = vadd.f32 %v1398_v47, %v252_v11 }
 0x126   :  { %v368_v33 = vadd.f32 1.0, %v352_v17  ;;  %v354_v34 = vmul.f32 0.3275911, %v338_v26  ;;  %v1432_v35 = vmul.f32 0.70710677, %v258_v27  ;;  %v367_v36 = vadd.f32 1.0, %v351_v21 }
 0x127   :  { %v1041_v23 = vpop.f32.mrb[8].mxu0  ;;  %v562_v37 = vsub.f32 0.0, %v338_v26  ;;  %v353_v38 = vmul.f32 0.3275911, %v337_v31  ;;  %v1434_v39 = vmul.f32 0.70710677, %v253_v32  ;;  %1143 = vpow2.f32 %v591_v24 }
 0x128   :  { %v262_v28 = vpop.f32.mrb[9].mxu0  ;;  %v595_v40 = vmul.f32 1.442695, %v576_v25  ;;  %v561_v41 = vsub.f32 0.0, %v337_v31  ;;  %v340_v42 = vand.u32 2147483647, %v1432_v35  ;;  %1145 = vpow2.f32 %v589_v29 }
 0x129   :  { %v1437_v44 = vmul.f32 0.5, %v233_v59  ;;  %v593_v45 = vmul.f32 1.442695, %v575_v30  ;;  %v339_v46 = vand.u32 2147483647, %v1434_v39  ;;  %1147 = vrcp.f32 %v368_v33 }
 0x12a   :  { %v1440_v49 = vmul.f32 0.5, %v248_v10  ;;  %v370_v50 = vadd.f32 1.0, %v354_v34  ;;  %v564_v51 = vsub.f32 0.0, %v340_v42  ;;  %1149 = vrcp.f32 %v367_v36 }
 0x12b   :  { %v1044_v43 = vpop.f32.mrb[10].mxu0  ;;  %v578_v54 = vmul.f32 %v562_v37, %v338_v26  ;;  %v1442_v55 = vmul.f32 0.5, %v243_v15  ;;  %v369_v56 = vadd.f32 1.0, %v353_v38  ;;  %1151 = vpow2.f32 %v595_v40 }
 0x12c   :  { %v272_v48 = vpop.f32.mrb[11].mxu0  ;;  %v577_v58 = vmul.f32 %v561_v41, %v337_v31  ;;  %v563_v59 = vsub.f32 0.0, %v339_v46  ;;  %v1447_v61 = vadd.f32 %v1041_v23, %v1398_v47  ;;  %v1451_v0 = vpop.eup %1139  ;;  %1153 = vpow2.f32 %v593_v45 }
 0x12d   :  { %v356_v1 = vmul.f32 0.3275911, %v340_v42  ;;  %v580_v2 = vmul.f32 %v564_v51, %v340_v42  ;;  %v1454_v3 = vadd.f32 %v1398_v47, %v262_v28  ;;  %1155 = vrcp.f32 %v370_v50  ;;  %v1466_v11 = vpop.eup %1141 }
 0x12e   :  { %v1456_v4 = vmul.f32 0.5, %v258_v27  ;;  %v355_v5 = vmul.f32 0.3275911, %v339_v46  ;;  %v1459_v6 = vmul.f32 0.70710677, %v1447_v61  ;;  %1157 = vrcp.f32 %v369_v56 }
 0x12f   :  { %v1444_v57 = vpop.f32.mrb[12].mxu0  ;;  %v599_v7 = vmul.f32 1.442695, %v578_v54  ;;  %v1461_v8 = vmul.f32 0.5, %v253_v32  ;;  %v1464_v9 = vmul.f32 0.70710677, %v1454_v3  ;;  %v579_v14 = vmul.f32 %v563_v59, %v339_v46 }
 0x130   :  { %v1449_v63 = vpop.f32.mrb[13].mxu0  ;;  %v597_v13 = vmul.f32 1.442695, %v577_v58  ;;  %v342_v15 = vand.u32 2147483647, %v1459_v6  ;;  %v1470_v16 = vadd.f32 %v1044_v43, %v1398_v47  ;;  %v372_v21 = vadd.f32 1.0, %v356_v1 }
 0x131   :  { %v603_v23 = vmul.f32 1.442695, %v580_v2  ;;  %v341_v24 = vand.u32 2147483647, %v1464_v9  ;;  %v273_v25 = vadd.f32 %v1398_v47, %v272_v48  ;;  %v1474_v26 = vpop.eup %1143  ;;  %v371_v27 = vadd.f32 1.0, %v355_v5 }
 0x132   :  { %1816 = vst [vmem:[#allocation2_spill] sm:$0xff] %v1470_v16  ;;  %v358_v28 = vmul.f32 0.3275911, %v342_v15  ;;  %v566_v29 = vsub.f32 0.0, %v342_v15  ;;  %v1477_v30 = vmul.f32 0.70710677, %v1470_v16  ;;  %v1479_v31 = vpop.eup %1145  ;;  %1159 = vpow2.f32 %v599_v7 }
 0x133   :  { %v1050_v10 = vpop.f32.mrb[14].mxu0  ;;  %v357_v32 = vmul.f32 0.3275911, %v341_v24  ;;  %v565_v33 = vsub.f32 0.0, %v341_v24  ;;  %v1481_v34 = vmul.f32 0.70710677, %v273_v25  ;;  %v1483_v36 = vpop.eup %1147  ;;  %1161 = vpow2.f32 %v597_v13 }
 0x134   :  { %v292_v17 = vpop.f32.mrb[15].mxu0  ;;  %v601_v37 = vmul.f32 1.442695, %v579_v14  ;;  %v582_v38 = vmul.f32 %v566_v29, %v342_v15  ;;  %v344_v40 = vand.u32 2147483647, %v1477_v30  ;;  %v1486_v41 = vpop.eup %1149  ;;  %1163 = vrcp.f32 %v372_v21 }
 0x135   :  { %v374_v42 = vadd.f32 1.0, %v358_v28  ;;  %v581_v43 = vmul.f32 %v565_v33, %v341_v24  ;;  %v343_v45 = vand.u32 2147483647, %v1481_v34  ;;  %v1489_v46 = vpop.eup %1151  ;;  %1165 = vrcp.f32 %v371_v27 }
 0x136   :  { %v373_v48 = vadd.f32 1.0, %v357_v32  ;;  %v360_v50 = vmul.f32 0.3275911, %v344_v40  ;;  %v568_v51 = vsub.f32 0.0, %v344_v40  ;;  %v1491_v54 = vpop.eup %1153  ;;  %1167 = vpow2.f32 %v603_v23 }
 0x137   :  { %v607_v56 = vmul.f32 1.442695, %v582_v38  ;;  %v359_v58 = vmul.f32 0.3275911, %v343_v45  ;;  %v567_v59 = vsub.f32 0.0, %v343_v45  ;;  %v1493_v1 = vpop.eup %1155  ;;  %1169 = vpow2.f32 %v601_v37 }
 0x138   :  { %v605_v2 = vmul.f32 1.442695, %v581_v43  ;;  %v584_v5 = vmul.f32 %v568_v51, %v344_v40  ;;  %v1497_v7 = vadd.f32 %v1444_v57, %v1398_v47  ;;  %v1499_v13 = vpop.eup %1157  ;;  %1171 = vrcp.f32 %v374_v42 }
 0x139   :  { %v376_v14 = vadd.f32 1.0, %v360_v50  ;;  %v583_v15 = vmul.f32 %v567_v59, %v343_v45  ;;  %v283_v21 = vadd.f32 %v1398_v47, %v1449_v63  ;;  %v1504_v23 = vmul.f32 0.5, %v1447_v61 }
 0x13a   :  { %1817 = vst [vmem:[#allocation3_spill] sm:$0xff] %v1497_v7  ;;  %1173 = vrcp.f32 %v373_v48  ;;  %v375_v24 = vadd.f32 1.0, %v359_v58  ;;  %v1507_v27 = vmul.f32 0.70710677, %v1497_v7  ;;  %v1510_v57 = vmul.f32 0.5, %v1454_v3 }
 0x13b   :  { %1818 = vst [vmem:[#allocation4_spill] sm:$0xff] %v1504_v23  ;;  %1175 = vpow2.f32 %v607_v56  ;;  %v1512_v28 = vmul.f32 0.5, %v273_v25  ;;  %v1514_v29 = vmul.f32 0.70710677, %v283_v21  ;;  %v611_v32 = vmul.f32 1.442695, %v584_v5 }
 0x13c   :  { %1819 = vst [vmem:[#allocation5_spill] sm:$0xff] %v1507_v27  ;;  %1820 = vst [vmem:[#allocation6_spill] sm:$0xff] %v1510_v57  ;;  %1177 = vpow2.f32 %v605_v2  ;;  %v346_v63 = vand.u32 2147483647, %v1507_v27  ;;  %v1518_v61 = vadd.f32 %v1050_v10, %v1398_v47  ;;  %v1520_v33 = vpop.eup %1159  ;;  %v609_v37 = vmul.f32 1.442695, %v583_v15 }
 0x13d   :  { %1821 = vst [vmem:[#allocation7_spill] sm:$0xff] %v1512_v28  ;;  %1822 = vst [vmem:[#allocation8_spill] sm:$0xff] %v1514_v29  ;;  %1179 = vrcp.f32 %v376_v14  ;;  %v345_v38 = vand.u32 2147483647, %v1514_v29  ;;  %v1524_v3 = vadd.f32 %v1398_v47, %v292_v17  ;;  %v1526_v25 = vpop.eup %1161  ;;  %v1533_v10 = vmul.f32 0.5, %v283_v21 }
 0x13e   :  { %1823 = vst [vmem:[#allocation9_spill] sm:$0xff] %v1518_v61  ;;  %1181 = vrcp.f32 %v375_v24  ;;  %v362_v40 = vmul.f32 0.3275911, %v346_v63  ;;  %v570_v42 = vsub.f32 0.0, %v346_v63  ;;  %v1529_v43 = vmul.f32 0.70710677, %v1518_v61  ;;  %v1531_v45 = vpop.eup %1163 }
 0x13f   :  { %1824 = vst [vmem:[#allocation10_spill] sm:$0xff] %v1524_v3  ;;  %1826 = vst [vmem:[#allocation12_spill] sm:$0xff] %v1533_v10  ;;  %v361_v48 = vmul.f32 0.3275911, %v345_v38  ;;  %v569_v50 = vsub.f32 0.0, %v345_v38  ;;  %v1538_v56 = vpop.eup %1165  ;;  %1183 = vpow2.f32 %v611_v32  ;;  %vm655_vm4 = vcmp.ge.f32.partialorder %v1412_v62, 0.0 }
 0x140   :  { %1825 = vst [vmem:[#allocation11_spill] sm:$0xff] %v1529_v43  ;;  %v1536_v51 = vmul.f32 0.70710677, %v1524_v3  ;;  %v378_v47 = vadd.f32 1.0, %v362_v40  ;;  %v586_v17 = vmul.f32 %v570_v42, %v346_v63  ;;  %v348_v58 = vand.u32 2147483647, %v1529_v43  ;;  %v1541_v59 = vpop.eup %1167 }
 0x141   :  { %1185 = vpow2.f32 %v609_v37  ;;  %v377_v2 = vadd.f32 1.0, %v361_v48  ;;  %v585_v5 = vmul.f32 %v569_v50, %v345_v38  ;;  %v1544_v15 = vpop.eup %1169  ;;  %v413_v38 = vmul.f32 1.0614054, %v1466_v11 }
 0x142   :  { %1827 = vst [vmem:[#allocation13_spill] sm:$0xff] %v1536_v51  ;;  %v347_v14 = vand.u32 2147483647, %v1536_v51  ;;  %1187 = vrcp.f32 %v378_v47  ;;  %v615_v21 = vmul.f32 1.442695, %v586_v17  ;;  %v572_v61 = vsub.f32 0.0, %v348_v58  ;;  %v1546_v7 = vpop.eup %1171 }
 0x143   :  { %v364_v24 = vmul.f32 0.3275911, %v348_v58  ;;  %1189 = vrcp.f32 %v377_v2  ;;  %v613_v32 = vmul.f32 1.442695, %v585_v5  ;;  %v414_v43 = vmul.f32 1.0614054, %v1451_v0 }
 0x144   :  { %v363_v63 = vmul.f32 0.3275911, %v347_v14  ;;  %v571_v40 = vsub.f32 0.0, %v347_v14  ;;  %v1548_v42 = vpop.eup %1173  ;;  %1191 = vpow2.f32 %v615_v21  ;;  %v588_v48 = vmul.f32 %v572_v61, %v348_v58 }
 0x145   :  { %v380_v37 = vadd.f32 1.0, %v364_v24  ;;  %v1551_v50 = vpop.eup %1175  ;;  %1193 = vpow2.f32 %v613_v32  ;;  %v429_v5 = vadd.f32 -1.4531521, %v413_v38  ;;  %v415_v10 = vmul.f32 1.0614054, %v1486_v41 }
 0x146   :  { %1828 = vst [vmem:[#allocation14_spill] sm:$0xff] %v1551_v50  ;;  %v379_v47 = vadd.f32 1.0, %v363_v63  ;;  %v587_v17 = vmul.f32 %v571_v40, %v347_v14  ;;  %v1554_v3 = vpop.eup %1177  ;;  %v619_v2 = vmul.f32 1.442695, %v588_v48  ;;  %v430_v58 = vadd.f32 -1.4531521, %v414_v43 }
 0x147   :  { %1829 = vst [vmem:[#allocation15_spill] sm:$0xff] %v1554_v3  ;;  %1195 = vrcp.f32 %v380_v37  ;;  %v1557_v16 = vpop.eup %1179  ;;  %v416_v21 = vmul.f32 1.0614054, %v1483_v36  ;;  %v445_v14 = vmul.f32 %v1466_v11, %v429_v5  ;;  %v431_v32 = vadd.f32 -1.4531521, %v415_v10 }
 0x148   :  { %1197 = vrcp.f32 %v379_v47  ;;  %v617_v61 = vmul.f32 1.442695, %v587_v17  ;;  %v1560_v24 = vpop.eup %1181  ;;  %v417_v63 = vmul.f32 1.0614054, %v1499_v13  ;;  %v446_v40 = vmul.f32 %v1451_v0, %v430_v58 }
 0x149   :  { %1199 = vpow2.f32 %v619_v2  ;;  %v432_v37 = vadd.f32 -1.4531521, %v416_v21  ;;  %v418_v48 = vmul.f32 1.0614054, %v1493_v1  ;;  %v1566_v38 = vpop.eup %1183  ;;  %v461_v47 = vadd.f32 1.4214138, %v445_v14 }
 0x14a   :  { %1201 = vpow2.f32 %v617_v61  ;;  %1830 = vst [vmem:[#allocation16_spill] sm:$0xff] %v1566_v38  ;;  %v447_v43 = vmul.f32 %v1486_v41, %v431_v32  ;;  %v433_v17 = vadd.f32 -1.4531521, %v417_v63  ;;  %v419_v28 = vmul.f32 1.0614054, %v1538_v56 }
 0x14b   :  { %v1570_v2 = vpop.eup %1185  ;;  %v462_v5 = vadd.f32 1.4214138, %v446_v40  ;;  %v448_v10 = vmul.f32 %v1483_v36, %v432_v37  ;;  %v434_v51 = vadd.f32 -1.4531521, %v418_v48  ;;  %v420_v61 = vmul.f32 1.0614054, %v1531_v45 }
 0x14c   :  { %1831 = vst [vmem:[#allocation17_spill] sm:$0xff] %v1570_v2  ;;  %v1574_v58 = vpop.eup %1187  ;;  %v477_v21 = vmul.f32 %v1466_v11, %v461_v47  ;;  %v463_v27 = vadd.f32 1.4214138, %v447_v43  ;;  %v449_v14 = vmul.f32 %v1499_v13, %v433_v17  ;;  %v435_v23 = vadd.f32 -1.4531521, %v419_v28 }
 0x14d   :  { %v1578_v32 = vpop.eup %1189  ;;  %v478_v63 = vmul.f32 %v1451_v0, %v462_v5  ;;  %v464_v57 = vadd.f32 1.4214138, %v448_v10  ;;  %v450_v40 = vmul.f32 %v1493_v1, %v434_v51  ;;  %v436_v38 = vadd.f32 -1.4531521, %v420_v61 }
 0x14e   :  { %v1582_v37 = vpop.eup %1191  ;;  %v493_v48 = vadd.f32 -0.28449672, %v477_v21  ;;  %v479_v2 = vmul.f32 %v1486_v41, %v463_v27  ;;  %v465_v50 = vadd.f32 1.4214138, %v449_v14  ;;  %v451_v47 = vmul.f32 %v1538_v56, %v435_v23 }
 0x14f   :  { %1832 = vst [vmem:[#allocation18_spill] sm:$0xff] %v1582_v37  ;;  %v1586_v43 = vpop.eup %1193  ;;  %v494_v17 = vadd.f32 -0.28449672, %v478_v63  ;;  %v480_v28 = vmul.f32 %v1483_v36, %v464_v57  ;;  %v466_v3 = vadd.f32 1.4214138, %v450_v40  ;;  %v452_v5 = vmul.f32 %v1531_v45, %v436_v38 }
 0x150   :  { %1833 = vst [vmem:[#allocation19_spill] sm:$0xff] %v1586_v43  ;;  %v509_v51 = vmul.f32 %v1466_v11, %v493_v48  ;;  %v495_v61 = vadd.f32 -0.28449672, %v479_v2  ;;  %v481_v21 = vmul.f32 %v1499_v13, %v465_v50  ;;  %v467_v37 = vadd.f32 1.4214138, %v451_v47 }
 0x151   :  { %v1590_v10 = vpop.eup %1195  ;;  %v510_v23 = vmul.f32 %v1451_v0, %v494_v17  ;;  %v496_v14 = vadd.f32 -0.28449672, %v480_v28  ;;  %v482_v63 = vmul.f32 %v1493_v1, %v466_v3  ;;  %v468_v43 = vadd.f32 1.4214138, %v452_v5 }
 0x152   :  { %v1594_v27 = vpop.eup %1197  ;;  %v525_v40 = vadd.f32 0.2548296, %v509_v51  ;;  %v511_v38 = vmul.f32 %v1486_v41, %v495_v61  ;;  %v497_v29 = vadd.f32 -0.28449672, %v481_v21  ;;  %v483_v48 = vmul.f32 %v1538_v56, %v467_v37 }
 0x153   :  { %v1598_v57 = vpop.eup %1199  ;;  %v526_v50 = vadd.f32 0.2548296, %v510_v23  ;;  %v512_v47 = vmul.f32 %v1483_v36, %v496_v14  ;;  %v498_v17 = vadd.f32 -0.28449672, %v482_v63  ;;  %v484_v28 = vmul.f32 %v1531_v45, %v468_v43 }
 0x154   :  { %1834 = vst [vmem:[#allocation20_spill] sm:$0xff] %v1598_v57  ;;  %v1602_v2 = vpop.eup %1201  ;;  %v541_v3 = vmul.f32 %v1466_v11, %v525_v40  ;;  %v527_v5 = vadd.f32 0.2548296, %v511_v38  ;;  %v513_v51 = vmul.f32 %v1499_v13, %v497_v29  ;;  %v499_v61 = vadd.f32 -0.28449672, %v483_v48 }
 0x155   :  { %v542_v37 = vmul.f32 %v1451_v0, %v526_v50  ;;  %v528_v21 = vadd.f32 0.2548296, %v512_v47  ;;  %v514_v23 = vmul.f32 %v1493_v1, %v498_v17  ;;  %v500_v57 = vadd.f32 -0.28449672, %v484_v28 }
 0x156   :  { %vm656_vm5 = vcmp.ge.f32.partialorder %v1410_v60, 0.0  ;;  %v621_v43 = vmul.f32 %v1479_v31, %v541_v3  ;;  %v543_v14 = vmul.f32 %v1486_v41, %v527_v5  ;;  %v529_v63 = vadd.f32 0.2548296, %v513_v51 }
 0x157   :  { %v515_v11 = vmul.f32 %v1538_v56, %v499_v61  ;;  %vm657_vm6 = vcmp.ge.f32.partialorder %v1426_v22, 0.0  ;;  %v622_v29 = vmul.f32 %v1474_v26, %v542_v37  ;;  %v544_v40 = vmul.f32 %v1483_v36, %v528_v21 }
 0x158   :  { %v530_v0 = vadd.f32 0.2548296, %v514_v23  ;;  %v516_v38 = vmul.f32 %v1531_v45, %v500_v57  ;;  %vm658_vm7 = vcmp.ge.f32.partialorder %v1420_v18, 0.0  ;;  %v637_v48 = vsub.f32 1.0, %v621_v43 }
 0x159   :  { %v623_v50 = vmul.f32 %v1491_v54, %v543_v14  ;;  %v545_v31 = vmul.f32 %v1499_v13, %v529_v63  ;;  %v531_v41 = vadd.f32 0.2548296, %v515_v11  ;;  %vm659_vm8 = vcmp.ge.f32.partialorder %v1434_v39, 0.0 }
 0x15a   :  { %v638_v47 = vsub.f32 1.0, %v622_v29  ;;  %v624_v17 = vmul.f32 %v1489_v46, %v544_v40  ;;  %v546_v26 = vmul.f32 %v1493_v1, %v530_v0  ;;  %v532_v28 = vadd.f32 0.2548296, %v516_v38 }
 0x15b   :  { %v669_v36 = vsub.f32 0.0, %v637_v48  ;;  %v639_v3 = vsub.f32 1.0, %v623_v50  ;;  %v625_v57 = vmul.f32 %v1526_v25, %v545_v31  ;;  %v547_v5 = vmul.f32 %v1538_v56, %v531_v41 }
 0x15c   :  { %v670_v51 = vsub.f32 0.0, %v638_v47  ;;  %v640_v61 = vsub.f32 1.0, %v624_v17  ;;  %v626_v54 = vmul.f32 %v1520_v33, %v546_v26  ;;  %v548_v13 = vmul.f32 %v1531_v45, %v532_v28 }
 0x15d   :  { %v685_v37 = vsel %vm653_vm2, %v637_v48, %v669_v36  ;;  %v671_v21 = vsub.f32 0.0, %v639_v3  ;;  %v641_v46 = vsub.f32 1.0, %v625_v57  ;;  %v627_v1 = vmul.f32 %v1544_v15, %v547_v5 }
 0x15e   :  { %v701_v23 = vadd.f32 1.0, %v685_v37  ;;  %v686_v43 = vsel %vm654_vm3, %v638_v47, %v670_v51  ;;  %v672_v25 = vsub.f32 0.0, %v640_v61  ;;  %v642_v14 = vsub.f32 1.0, %v626_v54 }
 0x15f   :  { %vm660_vm9 = vcmp.ge.f32.partialorder %v1432_v35, 0.0  ;;  %v702_v56 = vadd.f32 1.0, %v686_v43  ;;  %v687_v33 = vsel %vm655_vm4, %v639_v3, %v671_v21  ;;  %v673_v45 = vsub.f32 0.0, %v641_v46 }
 0x160   :  { %v643_v63 = vsub.f32 1.0, %v627_v1  ;;  %v717_v53 = vmul.f32 %v701_v23, %v1422_v19  ;;  %v703_v11 = vadd.f32 1.0, %v687_v33  ;;  %v688_v15 = vsel %vm656_vm5, %v640_v61, %v672_v25 }
 0x161   :  { %v674_v29 = vsub.f32 0.0, %v642_v14  ;;  %v718_v52 = vmul.f32 %v702_v56, %v1417_v12  ;;  %v704_v40 = vadd.f32 1.0, %v688_v15  ;;  %v689_v0 = vsel %vm657_vm6, %v641_v46, %v673_v45 }
 0x162   :  { %v675_v38 = vsub.f32 0.0, %v643_v63  ;;  %1059 = vmatprep.mubr.f32.mxu1 %v717_v53  ;;  %v719_v62 = vmul.f32 %v703_v11, %v1437_v44  ;;  %v705_v48 = vadd.f32 1.0, %v689_v0  ;;  %v628_v19 = vmul.f32 %v1541_v59, %v548_v13 }
 0x163   :  { %v690_v50 = vsel %vm658_vm7, %v642_v14, %v674_v29  ;;  %1060 = vmatmul.mubr.f32.vlgmr.msra.gmra.mrb[0].mxu1 %v718_v52  ;;  %v720_v60 = vmul.f32 %v704_v40, %v1424_v20  ;;  %v421_v22 = vmul.f32 1.0614054, %v1548_v42  ;;  %v422_v17 = vmul.f32 1.0614054, %v1546_v7 }
 0x164   :  { %v706_v31 = vadd.f32 1.0, %v690_v50  ;;  %v691_v12 = vsel %vm659_vm8, %v643_v63, %v675_v38  ;;  %1062 = vmatprep.mubr.f32.mxu1 %v719_v62  ;;  %v721_v41 = vmul.f32 %v705_v48, %v1442_v55  ;;  %v644_v44 = vsub.f32 1.0, %v628_v19 }
 0x165   :  { %v707_v47 = vadd.f32 1.0, %v691_v12  ;;  %v437_v26 = vadd.f32 -1.4531521, %v421_v22  ;;  %v423_v59 = vmul.f32 1.0614054, %v1560_v24  ;;  %vm661_vm10 = vcmp.ge.f32.partialorder %v1464_v9, 0.0 }
 0x166   :  { %v722_v18 = vmul.f32 %v706_v31, %v1440_v49  ;;  %v424_v20 = vmul.f32 1.0614054, %v1557_v16  ;;  %v676_v39 = vsub.f32 0.0, %v644_v44  ;;  %v438_v36 = vadd.f32 -1.4531521, %v422_v17 }
 0x167   :  { %v723_v28 = vmul.f32 %v707_v47, %v1461_v8  ;;  %v425_v3 = vmul.f32 1.0614054, %v1578_v32  ;;  %1063 = vmatmul.mubr.f32.gmra.mrb[2].mxu1 %v720_v60  ;;  %v453_v55 = vmul.f32 %v1548_v42, %v437_v26  ;;  %v439_v57 = vadd.f32 -1.4531521, %v423_v59 }
 0x168   :  { %v440_v5 = vadd.f32 -1.4531521, %v424_v20  ;;  %v426_v51 = vmul.f32 1.0614054, %v1574_v58  ;;  %1065 = vmatprep.mubr.f32.mxu1 %v721_v41  ;;  %v692_v49 = vsel %vm660_vm9, %v644_v44, %v676_v39  ;;  %v454_v61 = vmul.f32 %v1546_v7, %v438_v36 }
 0x169   :  { %v441_v54 = vadd.f32 -1.4531521, %v425_v3  ;;  %v427_v8 = vmul.f32 1.0614054, %v1594_v27  ;;  %v708_v13 = vadd.f32 1.0, %v692_v49  ;;  %v455_v21 = vmul.f32 %v1560_v24, %v439_v57 }
 0x16a   :  { %v469_v37 = vadd.f32 1.4214138, %v453_v55  ;;  %v456_v46 = vmul.f32 %v1557_v16, %v440_v5  ;;  %v470_v1 = vadd.f32 1.4214138, %v454_v61  ;;  %v442_v43 = vadd.f32 -1.4531521, %v426_v51 }
 0x16b   :  { %v457_v23 = vmul.f32 %v1578_v32, %v441_v54  ;;  %v443_v25 = vadd.f32 -1.4531521, %v427_v8  ;;  %1066 = vmatmul.mubr.f32.gmra.mrb[4].mxu1 %v722_v18  ;;  %v724_v35 = vmul.f32 %v708_v13, %v1456_v4  ;;  %v471_v56 = vadd.f32 1.4214138, %v455_v21  ;;  %v1835_v61 = vld [vmem:[#allocation8_spill] sm:$0xff]  ;;  %v1836_v54 = vld [vmem:[#allocation15_spill] sm:$0xff] }
 0x16c   :  { %v485_v14 = vmul.f32 %v1548_v42, %v469_v37  ;;  %v472_v33 = vadd.f32 1.4214138, %v456_v46  ;;  %1068 = vmatprep.mubr.f32.mxu1 %v723_v28  ;;  %v486_v45 = vmul.f32 %v1546_v7, %v470_v1  ;;  %v458_v53 = vmul.f32 %v1574_v58, %v442_v43  ;;  %v1837_v21 = vld [vmem:[#allocation14_spill] sm:$0xff] }
 0x16d   :  { %v473_v63 = vadd.f32 1.4214138, %v457_v23  ;;  %v459_v11 = vmul.f32 %v1594_v27, %v443_v25  ;;  %v487_v29 = vmul.f32 %v1560_v24, %v471_v56  ;;  %v428_v40 = vmul.f32 1.0614054, %v1590_v10  ;;  %v1838_v25 = vld [vmem:[#allocation17_spill] sm:$0xff] }
 0x16e   :  { %v501_v15 = vadd.f32 -0.28449672, %v485_v14  ;;  %v488_v52 = vmul.f32 %v1557_v16, %v472_v33  ;;  %v502_v4 = vadd.f32 -0.28449672, %v486_v45  ;;  %v474_v38 = vadd.f32 1.4214138, %v458_v53 }
 0x16f   :  { %v489_v0 = vmul.f32 %v1578_v32, %v473_v63  ;;  %v475_v62 = vadd.f32 1.4214138, %v459_v11  ;;  %1069 = vmatmul.mubr.f32.gmra.mrb[6].mxu1 %v724_v35  ;;  %v503_v50 = vadd.f32 -0.28449672, %v487_v29  ;;  %v444_v60 = vadd.f32 -1.4531521, %v428_v40 }
 0x170   :  { %v517_v48 = vmul.f32 %v1548_v42, %v501_v15  ;;  %v504_v19 = vadd.f32 -0.28449672, %v488_v52  ;;  %v518_v31 = vmul.f32 %v1546_v7, %v502_v4  ;;  %v490_v22 = vmul.f32 %v1574_v58, %v474_v38  ;;  %v1839_v14 = vld [vmem:[#allocation16_spill] sm:$0xff]  ;;  %v1840_v63 = vld [vmem:[#allocation19_spill] sm:$0xff]  ;;  %v1841_v4 = vld [vmem:[#allocation18_spill] sm:$0xff] }
 0x171   :  { %v505_v12 = vadd.f32 -0.28449672, %v489_v0  ;;  %v491_v41 = vmul.f32 %v1594_v27, %v475_v62  ;;  %v519_v44 = vmul.f32 %v1560_v24, %v503_v50  ;;  %v460_v18 = vmul.f32 %v1590_v10, %v444_v60 }
 0x172   :  { %v533_v47 = vadd.f32 0.2548296, %v517_v48  ;;  %v520_v17 = vmul.f32 %v1557_v16, %v504_v19  ;;  %v534_v26 = vadd.f32 0.2548296, %v518_v31  ;;  %v506_v20 = vadd.f32 -0.28449672, %v490_v22 }
 0x173   :  { %v521_v59 = vmul.f32 %v1578_v32, %v505_v12  ;;  %v507_v28 = vadd.f32 -0.28449672, %v491_v41  ;;  %vm662_vm11 = vcmp.ge.f32.partialorder %v1459_v6, 0.0  ;;  %v535_v36 = vadd.f32 0.2548296, %v519_v44 }
 0x174   :  { %v549_v39 = vmul.f32 %v1548_v42, %v533_v47  ;;  %v536_v3 = vadd.f32 0.2548296, %v520_v17  ;;  %v476_v55 = vadd.f32 1.4214138, %v460_v18  ;;  %vm664_vm12 = vcmp.ge.f32.partialorder %v1477_v30, 0.0  ;;  %v1842_v47 = vld [vmem:[#allocation6_spill] sm:$0xff] }
 0x175   :  { %vm663_vm13 = vcmp.ge.f32.partialorder %v1481_v34, 0.0  ;;  %v550_v57 = vmul.f32 %v1546_v7, %v534_v26  ;;  %v537_v5 = vadd.f32 0.2548296, %v521_v59  ;;  %v522_v51 = vmul.f32 %v1574_v58, %v506_v20  ;;  %v1843_v26 = vld [vmem:[#allocation4_spill] sm:$0xff]  ;;  %v1845_v34 = vld [vmem:[#allocation13_spill] sm:$0xff]  ;;  %v1846_v30 = vld [vmem:[#allocation7_spill] sm:$0xff] }
 0x176   :  { %v523_v49 = vmul.f32 %v1594_v27, %v507_v28  ;;  %vm665_vm14 = vcmp.ge.f32.partialorder %v1835_v61, 0.0  ;;  %v629_v8 = vmul.f32 %v1836_v54, %v549_v39  ;;  %v551_v42 = vmul.f32 %v1560_v24, %v535_v36  ;;  %v1844_v39 = vld [vmem:[#allocation5_spill] sm:$0xff] }
 0x177   :  { %v552_v13 = vmul.f32 %v1557_v16, %v536_v3  ;;  %v492_v37 = vmul.f32 %v1590_v10, %v476_v55  ;;  %v630_v46 = vmul.f32 %v1837_v21, %v550_v57  ;;  %v553_v1 = vmul.f32 %v1578_v32, %v537_v5  ;;  %v1847_v55 = vld [vmem:[#allocation2_spill] sm:$0xff] }
 0x178   :  { %v538_v7 = vadd.f32 0.2548296, %v522_v51  ;;  %v539_v23 = vadd.f32 0.2548296, %v523_v49  ;;  %v645_v43 = vsub.f32 1.0, %v629_v8  ;;  %v631_v35 = vmul.f32 %v1838_v25, %v551_v42  ;;  %v1848_v49 = vld [vmem:[#allocation12_spill] sm:$0xff] }
 0x179   :  { %v632_v56 = vmul.f32 %v1839_v14, %v552_v13  ;;  %v508_v33 = vadd.f32 -0.28449672, %v492_v37  ;;  %v646_v45 = vsub.f32 1.0, %v630_v46  ;;  %v633_v53 = vmul.f32 %v1840_v63, %v553_v1  ;;  %v1849_v8 = vld [vmem:[#allocation20_spill] sm:$0xff]  ;;  %v1850_v21 = vld [vmem:[#allocation10_spill] sm:$0xff]  ;;  %v1852_v25 = vld [vmem:[#allocation11_spill] sm:$0xff] }
 0x17a   :  { %v554_v24 = vmul.f32 %v1574_v58, %v538_v7  ;;  %v555_v16 = vmul.f32 %v1594_v27, %v539_v23  ;;  %v677_v11 = vsub.f32 0.0, %v645_v43  ;;  %v647_v15 = vsub.f32 1.0, %v631_v35  ;;  %v1851_v7 = vld [vmem:[#allocation3_spill] sm:$0xff] }
 0x17b   :  { %v648_v29 = vsub.f32 1.0, %v632_v56  ;;  %v524_v32 = vmul.f32 %v1590_v10, %v508_v33  ;;  %v678_v52 = vsub.f32 0.0, %v646_v45  ;;  %v649_v40 = vsub.f32 1.0, %v633_v53  ;;  %v1853_v56 = vld [vmem:[#allocation9_spill] sm:$0xff]  ;;  %v942_v53 = vld [vmem:[%s1803_s4] ss:$0 sm:$0xff] }
 0x17c   :  { %v634_v0 = vmul.f32 %v1841_v4, %v554_v24  ;;  %v635_v38 = vmul.f32 %v1602_v2, %v555_v16  ;;  %v693_v62 = vsel %vm661_vm10, %v645_v43, %v677_v11  ;;  %v679_v48 = vsub.f32 0.0, %v647_v15 }
 0x17d   :  { %v680_v50 = vsub.f32 0.0, %v648_v29  ;;  %v540_v19 = vadd.f32 0.2548296, %v524_v32  ;;  %v709_v58 = vadd.f32 1.0, %v693_v62  ;;  %v694_v27 = vsel %vm662_vm11, %v646_v45, %v678_v52 }
 0x17e   :  { %v681_v60 = vsub.f32 0.0, %v649_v40  ;;  %v650_v31 = vsub.f32 1.0, %v634_v0  ;;  %v710_v12 = vadd.f32 1.0, %v694_v27  ;;  %v695_v22 = vsel %vm663_vm13, %v647_v15, %v679_v48 }
 0x17f   :  { %v696_v41 = vsel %vm664_vm12, %v648_v29, %v680_v50  ;;  %v651_v2 = vsub.f32 1.0, %v635_v38  ;;  %v725_v9 = vmul.f32 %v709_v58, %v1842_v47  ;;  %v711_v44 = vadd.f32 1.0, %v695_v22 }
 0x180   :  { %v712_v17 = vadd.f32 1.0, %v696_v41  ;;  %v697_v18 = vsel %vm665_vm14, %v649_v40, %v681_v60  ;;  %v726_v6 = vmul.f32 %v710_v12, %v1843_v26  ;;  %v682_v20 = vsub.f32 0.0, %v650_v31 }
 0x181   :  { %v713_v59 = vadd.f32 1.0, %v697_v18  ;;  %v683_v28 = vsub.f32 0.0, %v651_v2  ;;  %vm666_vm15 = vcmp.ge.f32.partialorder %v1844_v39, 0.0  ;;  %vm667_vm1 = vcmp.ge.f32.partialorder %v1845_v34, 0.0  ;;  %1071 = vmatprep.mubr.f32.mxu1 %v725_v9 }
 0x182   :  { %v727_v36 = vmul.f32 %v711_v44, %v1846_v30  ;;  %v556_v3 = vmul.f32 %v1590_v10, %v540_v19  ;;  %v312_v57 = vmul.f32 0.5, %v1847_v55  ;;  %1072 = vmatmul.mubr.f32.gmra.mrb[8].mxu1 %v726_v6  ;;  %v698_v5 = vsel %vm666_vm15, %v650_v31, %v682_v20 }
 0x183   :  { %v699_v51 = vsel %vm667_vm1, %v651_v2, %v683_v28  ;;  %v729_v61 = vmul.f32 %v713_v59, %v1848_v49  ;;  %v714_v37 = vadd.f32 1.0, %v698_v5  ;;  %v315_v46 = vmul.f32 0.5, %v1850_v21 }
 0x184   :  { %1074 = vmatprep.mubr.f32.mxu1 %v727_v36  ;;  %v715_v54 = vadd.f32 1.0, %v699_v51  ;;  %v636_v42 = vmul.f32 %v1849_v8, %v556_v3  ;;  %v728_v13 = vmul.f32 %v712_v17, %v312_v57  ;;  %v314_v23 = vmul.f32 0.5, %v1851_v7 }
 0x185   :  { %vm668_vm2 = vcmp.ge.f32.partialorder %v1852_v25, 0.0  ;;  %v316_v33 = vmul.f32 0.5, %v1853_v56 }
 0x186   :  { %v652_v1 = vsub.f32 1.0, %v636_v42  ;;  %1075 = vmatmul.mubr.f32.gmra.mrb[10].mxu1 %v728_v13  ;;  %v731_v10 = vmul.f32 %v715_v54, %v315_v46  ;;  %v730_v35 = vmul.f32 %v714_v37, %v314_v23 }
 0x187   :  { %1077 = vmatprep.mubr.f32.mxu1 %v729_v61 }
 0x188   :  { %v684_v43 = vsub.f32 0.0, %v652_v1 }
 0x18a   :  { %v700_v14 = vsel %vm668_vm2, %v652_v1, %v684_v43  ;;  %1078 = vmatmul.mubr.f32.gmra.mrb[12].mxu1 %v730_v35 }
 0x18b   :  { %v716_v45 = vadd.f32 1.0, %v700_v14  ;;  %1080 = vmatprep.mubr.f32.mxu1 %v731_v10 }
 0x18d   :  { %v732_v63 = vmul.f32 %v716_v45, %v316_v33 }
 0x18f   :  { %1081 = vmatmul.mubr.f32.gmra.mrb[14].mxu1 %v732_v63 }
 0x236   :  { %v1061_v24 = vpop.f32.mrb[0].mxu1 }
 0x237   :  { %v816_v16 = vadd.f32 %v1061_v24, %v942_v53  ;;  %v810_v11 = vpop.f32.mrb[1].mxu1 }
 0x238   :  { %v811_v15 = vadd.f32 %v942_v53, %v810_v11 }
 0x239   :  { %890 = vst.msk [vmem:[%s1804_s5 + $0x8] sm:$0xff] %vm59_vm0, %v816_v16 }
 0x23a   :  { %889 = vst.msk [vmem:[%s1804_s5] sm:$0xff] %vm59_vm0, %v811_v15  ;;  %v1064_v29 = vpop.f32.mrb[2].mxu1 }
 0x23b   :  { %v826_v32 = vadd.f32 %v1064_v29, %v942_v53  ;;  %v820_v52 = vpop.f32.mrb[3].mxu1 }
 0x23c   :  { %v821_v40 = vadd.f32 %v942_v53, %v820_v52 }
 0x23d   :  { %892 = vst.msk [vmem:[%s1804_s5 + $0x18] sm:$0xff] %vm59_vm0, %v826_v32 }
 0x23e   :  { %891 = vst.msk [vmem:[%s1804_s5 + $0x10] sm:$0xff] %vm59_vm0, %v821_v40  ;;  %v1067_v4 = vpop.f32.mrb[4].mxu1 }
 0x23f   :  { %v836_v0 = vadd.f32 %v1067_v4, %v942_v53  ;;  %v830_v38 = vpop.f32.mrb[5].mxu1 }
 0x240   :  { %v831_v62 = vadd.f32 %v942_v53, %v830_v38 }
 0x241   :  { %894 = vst.msk [vmem:[%s1804_s5 + $0x28] sm:$0xff] %vm59_vm0, %v836_v0 }
 0x242   :  { %893 = vst.msk [vmem:[%s1804_s5 + $0x20] sm:$0xff] %vm59_vm0, %v831_v62  ;;  %v1070_v48 = vpop.f32.mrb[6].mxu1 }
 0x243   :  { %v846_v50 = vadd.f32 %v1070_v48, %v942_v53  ;;  %v840_v19 = vpop.f32.mrb[7].mxu1 }
 0x244   :  { %v841_v58 = vadd.f32 %v942_v53, %v840_v19 }
 0x245   :  { %896 = vst.msk [vmem:[%s1804_s5 + $0x38] sm:$0xff] %vm59_vm0, %v846_v50 }
 0x246   :  { %895 = vst.msk [vmem:[%s1804_s5 + $0x30] sm:$0xff] %vm59_vm0, %v841_v58 }
 0x255   :  { %v1073_v27 = vpop.f32.mrb[8].mxu1 }
 0x256   :  { %v856_v60 = vadd.f32 %v1073_v27, %v942_v53  ;;  %v850_v31 = vpop.f32.mrb[9].mxu1 }
 0x257   :  { %v851_v12 = vadd.f32 %v942_v53, %v850_v31 }
 0x258   :  { %898 = vst.msk [vmem:[%s1804_s5 + $0x48] sm:$0xff] %vm59_vm0, %v856_v60 }
 0x259   :  { %897 = vst.msk [vmem:[%s1804_s5 + $0x40] sm:$0xff] %vm59_vm0, %v851_v12  ;;  %v1076_v22 = vpop.f32.mrb[10].mxu1 }
 0x25a   :  { %v866_v41 = vadd.f32 %v1076_v22, %v942_v53  ;;  %v860_v2 = vpop.f32.mrb[11].mxu1 }
 0x25b   :  { %v861_v47 = vadd.f32 %v942_v53, %v860_v2 }
 0x25c   :  { %900 = vst.msk [vmem:[%s1804_s5 + $0x58] sm:$0xff] %vm59_vm0, %v866_v41 }
 0x25d   :  { %899 = vst.msk [vmem:[%s1804_s5 + $0x50] sm:$0xff] %vm59_vm0, %v861_v47  ;;  %v1079_v9 = vpop.f32.mrb[12].mxu1 }
 0x25e   :  { %v876_v44 = vadd.f32 %v1079_v9, %v942_v53  ;;  %v870_v17 = vpop.f32.mrb[13].mxu1 }
 0x25f   :  { %v871_v18 = vadd.f32 %v942_v53, %v870_v17 }
 0x260   :  { %902 = vst.msk [vmem:[%s1804_s5 + $0x68] sm:$0xff] %vm59_vm0, %v876_v44 }
 0x261   :  { %901 = vst.msk [vmem:[%s1804_s5 + $0x60] sm:$0xff] %vm59_vm0, %v871_v18 }
 0x262   :  { %v1082_v26 = vpop.f32.mrb[14].mxu1 }
 0x263   :  { %v886_v6 = vadd.f32 %v1082_v26, %v942_v53  ;;  %v880_v59 = vpop.f32.mrb[15].mxu1 }
 0x264   :  { %v881_v20 = vadd.f32 %v942_v53, %v880_v59 }
 0x265   :  { %904 = vst.msk [vmem:[%s1804_s5 + $0x78] sm:$0xff] %vm59_vm0, %v886_v6 }
 0x266   :  { %903 = vst.msk [vmem:[%s1804_s5 + $0x70] sm:$0xff] %vm59_vm0, %v881_v20 }

</bundles_post_ra>
